<compile_context>
chip_gen: v5e
topology: v5e:2x2
jax: 0.10.0
libtpu: 0.0.40
codegen_flags: <defaults>
</compile_context>

<pallas_src>
import jax
import jax.numpy as jnp
import numpy as np
from jax.experimental import pallas as pl
from jax.experimental.pallas import tpu as pltpu

N_BINS = 15  # matches _ECELoss(n_bins=15)


def _ece_kernel(n_ref, logits_ref, labels_ref, o_ref,
                cnt_ref, csum_ref, asum_ref):
    i = pl.program_id(0)
    tile_n = logits_ref.shape[0]
    total_n = n_ref[0]

    @pl.when(i == 0)
    def _init():
        cnt_ref[...] = jnp.zeros_like(cnt_ref)
        csum_ref[...] = jnp.zeros_like(csum_ref)
        asum_ref[...] = jnp.zeros_like(asum_ref)

    # Natural (tile_n, C) block -> upcast -> transpose to (C, tile_n) on the
    # XLU so every class-axis op below is lane-dense (samples on lanes).
    logits = jnp.transpose(logits_ref[...].astype(jnp.float32))   # (C, TN)
    labels = labels_ref[...]                                      # (1, TN) int32
    num_classes = logits.shape[0]

    # Softmax confidence: max prob == 1 / sum(exp(logits - col_max)).
    col_max = jnp.max(logits, axis=0, keepdims=True)              # (1, TN)
    denom = jnp.sum(jnp.exp(logits - col_max), axis=0, keepdims=True)

    # Validity mask for the ragged final block (narrow (1, TN) row only).
    gidx = i * tile_n + jax.lax.broadcasted_iota(jnp.int32, (1, tile_n), 1)
    valid = gidx < total_n

    # Exact reciprocal (approx could move a boundary-sitting confidence to the
    # neighbouring bin).  Sanitize invalid columns so 0 * NaN never happens.
    conf = jnp.where(valid, pl.reciprocal(denom), 0.0)            # (1, TN)

    # Argmax prediction (first occurrence on ties, matching argmax semantics).
    class_ids = jax.lax.broadcasted_iota(jnp.int32, logits.shape, 0)
    pred = jnp.min(jnp.where(logits == col_max, class_ids, num_classes),
                   axis=0, keepdims=True)                         # (1, TN)
    acc = (pred == labels).astype(jnp.float32)                    # (1, TN)

    # Bin k covers (k / N_BINS, (k + 1) / N_BINS]  =>  b = ceil(conf*NB) - 1.
    b = jnp.ceil(conf * N_BINS).astype(jnp.int32) - 1
    b = jnp.clip(b, 0, N_BINS - 1)
    b = jnp.where(valid, b, N_BINS)                               # invalid -> no bin

    bin_ids = jax.lax.broadcasted_iota(jnp.int32, (N_BINS, tile_n), 0)
    in_bin = (bin_ids == b).astype(jnp.float32)                   # (NB, TN) one wide cmp

    # Per-step cross-lane reductions (XLU) into tiny (N_BINS, 1) accumulators.
    cnt_ref[...] += jnp.sum(in_bin, axis=1, keepdims=True)
    csum_ref[...] += jnp.sum(in_bin * conf, axis=1, keepdims=True)
    asum_ref[...] += jnp.sum(in_bin * acc, axis=1, keepdims=True)

    @pl.when(i == pl.num_programs(0) - 1)
    def _finalize():
        cnt = cnt_ref[...]                                        # (NB, 1)
        safe_cnt = jnp.maximum(cnt, 1.0)
        prop = cnt / total_n.astype(jnp.float32)
        gap = jnp.abs(csum_ref[...] / safe_cnt - asum_ref[...] / safe_cnt) * prop
        gap = jnp.where(cnt > 0, gap, 0.0)                        # skip empty bins
        o_ref[...] = jnp.sum(gap, axis=0, keepdims=True)          # (1, 1)


def _derive_tile_n(num_classes, itemsize, *, max_tile=32768,
                   budget_bytes=20 * 1024 * 1024):
    """Pick a lane-aligned sample tile from a conservative VMEM budget."""
    c_lanes = ((num_classes + 127) // 128) * 128   # lane-padded natural block width
    c_sub = ((num_classes + 7) // 8) * 8           # sublane rows of transposed f32 temps
    # Double-buffered logits block + a handful of wide f32 intermediates
    # (transpose / exp / argmax select) + the (N_BINS, TN) one-hot & products.
    per_sample = 2 * c_lanes * itemsize + 6 * c_sub * 4 + 4 * 16 * 4
    tile = budget_bytes // per_sample
    tile = max(128, (tile // 128) * 128)
    return min(tile, max_tile)


def ece_loss(logits, labels, *, tile_n=None):
    """logits: (N, C) float (f32 or bf16), labels: (N,) int. Returns (1,) f32 ECE."""
    N, C = logits.shape
    labels_row = labels.astype(jnp.int32).reshape(1, N)   # free reshape, no HBM pass
    itemsize = jnp.dtype(logits.dtype).itemsize

    if tile_n is None:
        tile_n = _derive_tile_n(C, itemsize)
    if tile_n >= N:
        tile_n = N                                   # single block, no ragged tail
    else:
        tile_n = max(128, (tile_n // 128) * 128)     # labels block needs lane alignment
    num_tiles = pl.cdiv(N, tile_n)

    total_n = jnp.array([N], dtype=jnp.int32)        # scalar-prefetch (SMEM)

    out = pl.pallas_call(
        _ece_kernel,
        out_shape=jax.ShapeDtypeStruct((1, 1), jnp.float32),
        grid_spec=pltpu.PrefetchScalarGridSpec(
            num_scalar_prefetch=1,
            grid=(num_tiles,),
            in_specs=[
                pl.BlockSpec((tile_n, C), lambda i, n: (i, 0)),   # logits, natural layout
                pl.BlockSpec((1, tile_n), lambda i, n: (0, i)),   # labels as (1, N) row
            ],
            out_specs=pl.BlockSpec((1, 1), lambda i, n: (0, 0)),
            scratch_shapes=[
                pltpu.VMEM((N_BINS, 1), jnp.float32),             # per-bin count
                pltpu.VMEM((N_BINS, 1), jnp.float32),             # per-bin conf sum
                pltpu.VMEM((N_BINS, 1), jnp.float32),             # per-bin acc sum
            ],
        ),
        compiler_params=pltpu.CompilerParams(
            dimension_semantics=("arbitrary",),
            vmem_limit_bytes=32 * 1024 * 1024,
        ),
    )(total_n, logits, labels_row)
    return out.reshape(1)


def ece_reference(logits, labels):
    """Plain-JAX reference replicating the PyTorch forward."""
    softmaxes = jax.nn.softmax(logits.astype(jnp.float32), axis=1)
    confidences = jnp.max(softmaxes, axis=1)
    predictions = jnp.argmax(softmaxes, axis=1)
    accuracies = (predictions == labels).astype(jnp.float32)
    ece = jnp.zeros(1, jnp.float32)
    bounds = np.linspace(0, 1, N_BINS + 1)
    for lo, hi in zip(bounds[:-1], bounds[1:]):
        in_bin = (confidences > lo) & (confidences <= hi)
        prop = jnp.mean(in_bin.astype(jnp.float32))
        cnt = jnp.sum(in_bin.astype(jnp.float32))
        acc_in = jnp.sum(accuracies * in_bin) / jnp.maximum(cnt, 1.0)
        conf_in = jnp.sum(confidences * in_bin) / jnp.maximum(cnt, 1.0)
        ece = ece + jnp.where(cnt > 0, jnp.abs(conf_in - acc_in) * prop, 0.0)
    return ece


if __name__ == "__main__":
    key = jax.random.PRNGKey(0)
    k1, k2, k3, k4 = jax.random.split(key, 4)

    # Small single-block case.
    N1, C1 = 64, 10
    logits1 = jax.random.normal(k1, (N1, C1), dtype=jnp.float32) * 2.0
    labels1 = jax.random.randint(k2, (N1,), 0, C1, dtype=jnp.int32)
    out1 = jax.block_until_ready(ece_loss(logits1, labels1))
    ref1 = jax.block_until_ready(ece_reference(logits1, labels1))
    np.testing.assert_allclose(np.asarray(out1), np.asarray(ref1),
                               rtol=1e-4, atol=1e-5)

    # Multi-tile case with a ragged final block (no wrapper-side padding).
    N2, C2 = 300, 10
    logits2 = jax.random.normal(k3, (N2, C2), dtype=jnp.float32) * 2.0
    labels2 = jax.random.randint(k4, (N2,), 0, C2, dtype=jnp.int32)
    out2 = jax.block_until_ready(ece_loss(logits2, labels2, tile_n=128))
    ref2 = jax.block_until_ready(ece_reference(logits2, labels2))
    np.testing.assert_allclose(np.asarray(out2), np.asarray(ref2),
                               rtol=1e-4, atol=1e-5)

    print("KERNEL_OK")
</pallas_src>

<mosaic_0001>
module attributes {stable_mosaic.version = 11 : i64} {
  func.func @_ece_kernel(%arg0: i32, %arg1: memref<1xi32, #tpu.memory_space<smem>>, %arg2: memref<64x10xf32, #tpu.memory_space<vmem>>, %arg3: memref<1x64xi32, #tpu.memory_space<vmem>>, %arg4: memref<1x1xf32, #tpu.memory_space<vmem>>, %arg5: memref<15x1xf32, #tpu.memory_space<vmem>>, %arg6: memref<15x1xf32, #tpu.memory_space<vmem>>, %arg7: memref<15x1xf32, #tpu.memory_space<vmem>>) attributes {dimension_semantics = [#tpu.dimension_semantics<arbitrary>], iteration_bounds = array<i64: 1>, scalar_prefetch = 1 : i64, scratch_operands = 3 : i64, tpu.core_type = #tpu.core_type<tc>, window_params = [{transform_indices = @transform_0, window_bounds = array<i64: 64, 10>}, {transform_indices = @transform_1, window_bounds = array<i64: 1, 64>}, {pipeline_mode = #tpu.pipeline_mode<synchronous>, transform_indices = @transform_2, window_bounds = array<i64: 1, 1>}]} {
    %c0 = arith.constant 0 : index
    %0 = memref.load %arg1[%c0] : memref<1xi32, #tpu.memory_space<smem>>
    %c0_i32 = arith.constant 0 : i32
    %1 = arith.cmpi eq, %arg0, %c0_i32 : i32
    %2 = arith.extui %1 : i1 to i32
    %c0_i32_0 = arith.constant 0 : i32
    %3 = arith.cmpi ne, %2, %c0_i32_0 : i32
    scf.if %3 {
      %cst_27 = arith.constant 0.000000e+00 : f32
      %72 = vector.broadcast %cst_27 : f32 to vector<15x1xf32>
      %c0_28 = arith.constant 0 : index
      %c0_29 = arith.constant 0 : index
      %73 = vector.load %arg5[%c0_28, %c0_29] : memref<15x1xf32, #tpu.memory_space<vmem>>, vector<15x1xf32>
      tpu.vector_store %arg5[%c0_28, %c0_29], %72 {strides = array<i32>} : memref<15x1xf32, #tpu.memory_space<vmem>>, vector<15x1xf32>,
      %cst_30 = arith.constant 0.000000e+00 : f32
      %74 = vector.broadcast %cst_30 : f32 to vector<15x1xf32>
      %c0_31 = arith.constant 0 : index
      %c0_32 = arith.constant 0 : index
      %75 = vector.load %arg6[%c0_31, %c0_32] : memref<15x1xf32, #tpu.memory_space<vmem>>, vector<15x1xf32>
      tpu.vector_store %arg6[%c0_31, %c0_32], %74 {strides = array<i32>} : memref<15x1xf32, #tpu.memory_space<vmem>>, vector<15x1xf32>,
      %cst_33 = arith.constant 0.000000e+00 : f32
      %76 = vector.broadcast %cst_33 : f32 to vector<15x1xf32>
      %c0_34 = arith.constant 0 : index
      %c0_35 = arith.constant 0 : index
      %77 = vector.load %arg7[%c0_34, %c0_35] : memref<15x1xf32, #tpu.memory_space<vmem>>, vector<15x1xf32>
      tpu.vector_store %arg7[%c0_34, %c0_35], %76 {strides = array<i32>} : memref<15x1xf32, #tpu.memory_space<vmem>>, vector<15x1xf32>,
    } else {
    }
    %c0_1 = arith.constant 0 : index
    %c0_2 = arith.constant 0 : index
    %4 = vector.load %arg2[%c0_1, %c0_2] : memref<64x10xf32, #tpu.memory_space<vmem>>, vector<64x10xf32>
    %5 = tpu.transpose %4, [1, 0] : vector<64x10xf32> -> vector<10x64xf32>
    %c0_3 = arith.constant 0 : index
    %c0_4 = arith.constant 0 : index
    %6 = vector.load %arg3[%c0_3, %c0_4] : memref<1x64xi32, #tpu.memory_space<vmem>>, vector<1x64xi32>
    %cst = arith.constant dense<0xFF800000> : vector<64xf32>
    %7 = vector.multi_reduction <maximumf>, %5, %cst [0] : vector<10x64xf32> to vector<64xf32>
    %8 = vector.shape_cast %7 : vector<64xf32> to vector<1x64xf32>
    %9 = vector.broadcast %8 : vector<1x64xf32> to vector<10x64xf32>
    %10 = arith.subf %5, %9 : vector<10x64xf32>
    %11 = math.exp %10 : vector<10x64xf32>
    %cst_5 = arith.constant dense<0.000000e+00> : vector<64xf32>
    %12 = vector.multi_reduction <add>, %11, %cst_5 [0] : vector<10x64xf32> to vector<64xf32>
    %13 = vector.shape_cast %12 : vector<64xf32> to vector<1x64xf32>
    %c64_i32 = arith.constant 64 : i32
    %14 = arith.muli %arg0, %c64_i32 : i32
    %15 = tpu.iota {dimensions = array<i32: 1>} : vector<1x64xi32>
    %16 = vector.broadcast %14 : i32 to vector<1x64xi32>
    %17 = arith.addi %16, %15 : vector<1x64xi32>
    %18 = vector.broadcast %0 : i32 to vector<1x64xi32>
    %19 = arith.cmpi slt, %17, %18 : vector<1x64xi32>
    %20 = tpu.reciprocal %13 : vector<1x64xf32> -> vector<1x64xf32>
    %cst_6 = arith.constant 0.000000e+00 : f32
    %21 = vector.broadcast %cst_6 : f32 to vector<1x64xf32>
    %22 = arith.select %19, %20, %21 : vector<1x64xi1>, vector<1x64xf32>
    %23 = tpu.iota {dimensions = array<i32: 0>} : vector<10x64xi32>
    %24 = vector.broadcast %8 : vector<1x64xf32> to vector<10x64xf32>
    %25 = arith.cmpf oeq, %5, %24 : vector<10x64xf32>
    %c10_i32 = arith.constant 10 : i32
    %26 = vector.broadcast %c10_i32 : i32 to vector<10x64xi32>
    %27 = arith.select %25, %23, %26 : vector<10x64xi1>, vector<10x64xi32>
    %cst_7 = arith.constant dense<2147483647> : vector<64xi32>
    %28 = vector.multi_reduction <minsi>, %27, %cst_7 [0] : vector<10x64xi32> to vector<64xi32>
    %29 = vector.shape_cast %28 : vector<64xi32> to vector<1x64xi32>
    %30 = arith.cmpi eq, %29, %6 : vector<1x64xi32>
    %31 = arith.extui %30 : vector<1x64xi1> to vector<1x64xi32>
    %32 = arith.sitofp %31 : vector<1x64xi32> to vector<1x64xf32>
    %cst_8 = arith.constant 1.500000e+01 : f32
    %33 = vector.broadcast %cst_8 : f32 to vector<1x64xf32>
    %34 = arith.mulf %22, %33 : vector<1x64xf32>
    %35 = math.ceil %34 : vector<1x64xf32>
    %36 = arith.fptosi %35 : vector<1x64xf32> to vector<1x64xi32>
    %c1_i32 = arith.constant 1 : i32
    %37 = vector.broadcast %c1_i32 : i32 to vector<1x64xi32>
    %38 = arith.subi %36, %37 : vector<1x64xi32>
    %c0_i32_9 = arith.constant 0 : i32
    %c14_i32 = arith.constant 14 : i32
    %39 = vector.broadcast %c0_i32_9 : i32 to vector<1x64xi32>
    %40 = arith.maxsi %39, %38 : vector<1x64xi32>
    %41 = vector.broadcast %c14_i32 : i32 to vector<1x64xi32>
    %42 = arith.minsi %41, %40 : vector<1x64xi32>
    %c15_i32 = arith.constant 15 : i32
    %43 = vector.broadcast %c15_i32 : i32 to vector<1x64xi32>
    %44 = arith.select %19, %42, %43 : vector<1x64xi1>, vector<1x64xi32>
    %45 = tpu.iota {dimensions = array<i32: 0>} : vector<15x64xi32>
    %46 = vector.broadcast %44 : vector<1x64xi32> to vector<15x64xi32>
    %47 = arith.cmpi eq, %45, %46 : vector<15x64xi32>
    %48 = arith.extui %47 : vector<15x64xi1> to vector<15x64xi32>
    %49 = arith.sitofp %48 : vector<15x64xi32> to vector<15x64xf32>
    %c0_10 = arith.constant 0 : index
    %c0_11 = arith.constant 0 : index
    %50 = vector.load %arg5[%c0_10, %c0_11] : memref<15x1xf32, #tpu.memory_space<vmem>>, vector<15x1xf32>
    %cst_12 = arith.constant dense<0.000000e+00> : vector<15xf32>
    %51 = vector.multi_reduction <add>, %49, %cst_12 [1] : vector<15x64xf32> to vector<15xf32>
    %52 = vector.shape_cast %51 : vector<15xf32> to vector<15x1xf32>
    %53 = arith.addf %50, %52 : vector<15x1xf32>
    %c0_13 = arith.constant 0 : index
    %c0_14 = arith.constant 0 : index
    %54 = vector.load %arg5[%c0_13, %c0_14] : memref<15x1xf32, #tpu.memory_space<vmem>>, vector<15x1xf32>
    tpu.vector_store %arg5[%c0_13, %c0_14], %53 {strides = array<i32>} : memref<15x1xf32, #tpu.memory_space<vmem>>, vector<15x1xf32>,
    %c0_15 = arith.constant 0 : index
    %c0_16 = arith.constant 0 : index
    %55 = vector.load %arg6[%c0_15, %c0_16] : memref<15x1xf32, #tpu.memory_space<vmem>>, vector<15x1xf32>
    %56 = vector.broadcast %22 : vector<1x64xf32> to vector<15x64xf32>
    %57 = arith.mulf %49, %56 : vector<15x64xf32>
    %cst_17 = arith.constant dense<0.000000e+00> : vector<15xf32>
    %58 = vector.multi_reduction <add>, %57, %cst_17 [1] : vector<15x64xf32> to vector<15xf32>
    %59 = vector.shape_cast %58 : vector<15xf32> to vector<15x1xf32>
    %60 = arith.addf %55, %59 : vector<15x1xf32>
    %c0_18 = arith.constant 0 : index
    %c0_19 = arith.constant 0 : index
    %61 = vector.load %arg6[%c0_18, %c0_19] : memref<15x1xf32, #tpu.memory_space<vmem>>, vector<15x1xf32>
    tpu.vector_store %arg6[%c0_18, %c0_19], %60 {strides = array<i32>} : memref<15x1xf32, #tpu.memory_space<vmem>>, vector<15x1xf32>,
    %c0_20 = arith.constant 0 : index
    %c0_21 = arith.constant 0 : index
    %62 = vector.load %arg7[%c0_20, %c0_21] : memref<15x1xf32, #tpu.memory_space<vmem>>, vector<15x1xf32>
    %63 = vector.broadcast %32 : vector<1x64xf32> to vector<15x64xf32>
    %64 = arith.mulf %49, %63 : vector<15x64xf32>
    %cst_22 = arith.constant dense<0.000000e+00> : vector<15xf32>
    %65 = vector.multi_reduction <add>, %64, %cst_22 [1] : vector<15x64xf32> to vector<15xf32>
    %66 = vector.shape_cast %65 : vector<15xf32> to vector<15x1xf32>
    %67 = arith.addf %62, %66 : vector<15x1xf32>
    %c0_23 = arith.constant 0 : index
    %c0_24 = arith.constant 0 : index
    %68 = vector.load %arg7[%c0_23, %c0_24] : memref<15x1xf32, #tpu.memory_space<vmem>>, vector<15x1xf32>
    tpu.vector_store %arg7[%c0_23, %c0_24], %67 {strides = array<i32>} : memref<15x1xf32, #tpu.memory_space<vmem>>, vector<15x1xf32>,
    %c0_i32_25 = arith.constant 0 : i32
    %69 = arith.cmpi eq, %arg0, %c0_i32_25 : i32
    %70 = arith.extui %69 : i1 to i32
    %c0_i32_26 = arith.constant 0 : i32
    %71 = arith.cmpi ne, %70, %c0_i32_26 : i32
    scf.if %71 {
      %c0_27 = arith.constant 0 : index
      %c0_28 = arith.constant 0 : index
      %72 = vector.load %arg5[%c0_27, %c0_28] : memref<15x1xf32, #tpu.memory_space<vmem>>, vector<15x1xf32>
      %cst_29 = arith.constant 1.000000e+00 : f32
      %73 = vector.broadcast %cst_29 : f32 to vector<15x1xf32>
      %74 = arith.maximumf %72, %73 : vector<15x1xf32>
      %75 = arith.sitofp %0 : i32 to f32
      %76 = vector.broadcast %75 : f32 to vector<15x1xf32>
      %77 = arith.divf %72, %76 : vector<15x1xf32>
      %c0_30 = arith.constant 0 : index
      %c0_31 = arith.constant 0 : index
      %78 = vector.load %arg6[%c0_30, %c0_31] : memref<15x1xf32, #tpu.memory_space<vmem>>, vector<15x1xf32>
      %79 = arith.divf %78, %74 : vector<15x1xf32>
      %c0_32 = arith.constant 0 : index
      %c0_33 = arith.constant 0 : index
      %80 = vector.load %arg7[%c0_32, %c0_33] : memref<15x1xf32, #tpu.memory_space<vmem>>, vector<15x1xf32>
      %81 = arith.divf %80, %74 : vector<15x1xf32>
      %82 = arith.subf %79, %81 : vector<15x1xf32>
      %83 = math.absf %82 : vector<15x1xf32>
      %84 = arith.mulf %83, %77 : vector<15x1xf32>
      %cst_34 = arith.constant 0.000000e+00 : f32
      %85 = vector.broadcast %cst_34 : f32 to vector<15x1xf32>
      %86 = arith.cmpf ogt, %72, %85 : vector<15x1xf32>
      %cst_35 = arith.constant 0.000000e+00 : f32
      %87 = vector.broadcast %cst_35 : f32 to vector<15x1xf32>
      %88 = arith.select %86, %84, %87 : vector<15x1xi1>, vector<15x1xf32>
      %cst_36 = arith.constant dense<0.000000e+00> : vector<1xf32>
      %89 = vector.multi_reduction <add>, %88, %cst_36 [0] : vector<15x1xf32> to vector<1xf32>
      %90 = vector.shape_cast %89 : vector<1xf32> to vector<1x1xf32>
      %c0_37 = arith.constant 0 : index
      %c0_38 = arith.constant 0 : index
      %91 = vector.load %arg4[%c0_37, %c0_38] : memref<1x1xf32, #tpu.memory_space<vmem>>, vector<1x1xf32>
      tpu.vector_store %arg4[%c0_37, %c0_38], %90 {strides = array<i32>} : memref<1x1xf32, #tpu.memory_space<vmem>>, vector<1x1xf32>,
    } else {
    }
    return
  }
  func.func @transform_0(%arg0: i32, %arg1: memref<1xi32, #tpu.memory_space<smem>>) -> (i32, i32) {
    %c0_i32 = arith.constant 0 : i32
    %c0_i32_0 = arith.constant 0 : i32
    return %arg0, %c0_i32 : i32, i32
  }
  func.func @transform_1(%arg0: i32, %arg1: memref<1xi32, #tpu.memory_space<smem>>) -> (i32, i32) {
    %c0_i32 = arith.constant 0 : i32
    %c0_i32_0 = arith.constant 0 : i32
    return %c0_i32, %arg0 : i32, i32
  }
  func.func @transform_2(%arg0: i32, %arg1: memref<1xi32, #tpu.memory_space<smem>>) -> (i32, i32) {
    %c0_i32 = arith.constant 0 : i32
    %c0_i32_0 = arith.constant 0 : i32
    %c0_i32_1 = arith.constant 0 : i32
    return %c0_i32, %c0_i32_0 : i32, i32
  }
}

</mosaic_0001>

<bundles_post_ra>
// kernel: tpu_custom_call.1
= control target key start
LH: loop header
LB: loop body
LE: loop exit
PB: predicated region body
PF: predicated region fallthrough
CT: control target
= control target key end

     0   :  { %s456_s0 = inlined_call_operand.<no memory space> [shape: s32[1], index: 0, kind: input, shape index: {}]   ;;  %s457_s1 = inlined_call_operand.vmem [shape: f32[64,10], index: 1, kind: input, shape index: {}]   ;;  %s458_s2 = inlined_call_operand.vmem [shape: s32[1,64], index: 2, kind: input, shape index: {}]   ;;  %s459_s3 = inlined_call_operand.hbm [shape: f32[1,1], index: 3, kind: output, shape index: {}]  }
   0x1   :  { %v27_v0 = vld [vmem:[%s457_s1] sm:$0xff] }
   0x2   :  { %35 = vxpose.xlu0.b32.start [1/8] (short) (narrow) %v27_v0, 16 }
   0x3   :  { %9 = vsyncpa [#allocation8], 0  ;;  %v28_v1 = vld [vmem:[%s457_s1 + $0x8] sm:$0xff]  ;;  %v29_v2 = vld [vmem:[%s457_s1 + $0x10] sm:$0xff]  ;;  %vm68_vm0 = vcmask 523264   ;;  %vm70_vm1 = vcmask 517120   ;;  %v95_v14 = vlaneseq  ;;  %v99_v47 = vstv %s456_s0  ;;  %s205_s5 = scvt.s32.f32 %s456_s0 }
   0x4   :  { %v30_v3 = vld [vmem:[%s457_s1 + $0x18] sm:$0xff]  ;;  %v31_v4 = vld [vmem:[%s457_s1 + $0x20] sm:$0xff]  ;;  %v32_v5 = vld [vmem:[%s457_s1 + $0x28] sm:$0xff]  ;;  %s343_s0 = smov [#allocation7]   ;;  %s287_s9 = sshll.u32 %s459_s3, 4  ;;  %s288_s9 = int_to_ptr.hbm [resolvable:$true] %s287_s9 }
   0x5   :  { %v33_v6 = vld [vmem:[%s457_s1 + $0x30] sm:$0xff]  ;;  %v34_v7 = vld [vmem:[%s457_s1 + $0x38] sm:$0xff]  ;;  %v390_v17 = vshrl.u32 %v95_v14, 7  ;;  %v96_v46 = vand.u32 127, %v95_v14  ;;  %s285_s6 = sshll.u32 %s343_s0, 4  ;;  %s286_s6 = int_to_ptr.vmem [resolvable:$true] %s285_s6 }
   0x7   :  { %v393_v20 = vadd.s32 8, %v390_v17  ;;  %vm404_vm8 = vcmp.lt.s32.totalorder %v96_v46, %v99_v47 }
   0xa   :  { %36 = vxpose.xlu0.b32.cont [2/8] (short) (narrow) %v28_v1, 16 }
  0x12   :  { %37 = vxpose.xlu0.b32.cont [3/8] (short) (narrow) %v29_v2, 16 }
  0x1a   :  { %38 = vxpose.xlu0.b32.cont [4/8] (short) (narrow) %v30_v3, 16 }
  0x22   :  { %39 = vxpose.xlu0.b32.cont [5/8] (short) (narrow) %v31_v4, 16  ;;  %v342_v4 = vmov 0.0  }
  0x2a   :  { %40 = vxpose.xlu0.b32.cont [6/8] (short) (narrow) %v32_v5, 16 }
  0x32   :  { %41 = vxpose.xlu0.b32.cont [7/8] (short) (narrow) %v33_v6, 16 }
  0x3a   :  { %42 = vxpose.xlu0.b32.end [8/8] (short) (narrow) %v34_v7, 16 }
  0xa6   :  { %v51_v8 = vpop.trf.xlu0 }
  0xa7   :  { %v69_v10 = vsel %vm68_vm0, %v51_v8, -inf }
  0xae   :  { %v52_v9 = vpop.trf.xlu0 }
  0xaf   :  { %v71_v11 = vsel %vm70_vm1, %v52_v9, -inf }
  0xb0   :  { %v72_v12 = vmax.f32 %v69_v10, %v71_v11 }
  0xb2   :  { %v73_v13 = vrot.slane %v72_v12, 4 }
  0xb4   :  { %v74_v15 = vmax.f32 %v72_v12, %v73_v13 }
  0xb6   :  { %v75_v16 = vrot.slane %v74_v15, 2 }
  0xb8   :  { %v76_v18 = vmax.f32 %v74_v15, %v75_v16 }
  0xba   :  { %v77_v19 = vrot.slane %v76_v18, 1 }
  0xbc   :  { %v78_v21 = vmax.f32 %v76_v18, %v77_v19 }
  0xbe   :  { %v79_v22 = vsub.f32 %v51_v8, %v78_v21  ;;  %v80_v23 = vsub.f32 %v52_v9, %v78_v21  ;;  %vm119_vm2 = vcmp.eq.f32.partialorder %v51_v8, %v78_v21  ;;  %vm120_vm3 = vcmp.eq.f32.partialorder %v52_v9, %v78_v21  ;;  %v67_v8 = vld [vmem:[%s458_s2] sm:$0x1] }
  0xbf   :  { %v121_v24 = vsel %vm119_vm2, %v390_v17, 10  ;;  %v122_v25 = vsel %vm120_vm3, %v393_v20, 10  ;;  %vm159_vm3 = vcmask 522240  }
  0xc0   :  { %v81_v26 = vmul.f32 1.442695, %v79_v22  ;;  %v83_v27 = vmul.f32 1.442695, %v80_v23  ;;  %v123_v28 = vsel %vm68_vm0, %v121_v24, 2147483647 }
  0xc1   :  { %v124_v29 = vsel %vm70_vm1, %v122_v25, 2147483647 }
  0xc2   :  { %304 = vpow2.f32 %v81_v26  ;;  %vm125_vm4 = vcmp.lt.s32.totalorder %v123_v28, %v124_v29 }
  0xc3   :  { %306 = vpow2.f32 %v83_v27  ;;  %v126_v30 = vsel %vm125_vm4, %v123_v28, %v124_v29  ;;  %vm19_vm4 = vcmask 7168   ;;  %v206_v27 = vstv %s205_s5 }
  0xc4   :  { %v127_v43 = vrot.slane %v126_v30, 4  ;;  %20 = vst.msk [vmem:[#allocation2] sm:$0xff] %vm19_vm4, %v342_v4 }
  0xc5   :  { %23 = vst.msk [vmem:[#allocation3] sm:$0xff] %vm19_vm4, %v342_v4 }
  0xc6   :  { %vm128_vm5 = vcmp.lt.s32.totalorder %v126_v30, %v127_v43  ;;  %25 = vst.msk [vmem:[#allocation4] sm:$0xff] %vm19_vm4, %v342_v4 }
  0xc7   :  { %v129_v52 = vsel %vm128_vm5, %v126_v30, %v127_v43  ;;  %vm21_vm5 = vcmask 6144  }
  0xc8   :  { %v305_v31 = vpop.eup %304  ;;  %v130_v57 = vrot.slane %v129_v52, 2  ;;  %22 = vst.msk [vmem:[#allocation2 + $0x8] sm:$0x7f] %vm21_vm5, %v342_v4 }
  0xc9   :  { %v307_v32 = vpop.eup %306  ;;  %v85_v33 = vsel %vm68_vm0, %v305_v31, 0.0  ;;  %24 = vst.msk [vmem:[#allocation3 + $0x8] sm:$0x7f] %vm21_vm5, %v342_v4 }
  0xca   :  { %v86_v34 = vsel %vm70_vm1, %v307_v32, 0.0  ;;  %vm131_vm11 = vcmp.lt.s32.totalorder %v129_v52, %v130_v57  ;;  %26 = vst.msk [vmem:[#allocation4 + $0x8] sm:$0x7f] %vm21_vm5, %v342_v4 }
  0xcb   :  { %v87_v35 = vadd.f32 %v86_v34, %v85_v33  ;;  %v132_v63 = vsel %vm131_vm11, %v129_v52, %v130_v57  ;;  %v154_v21 = vld [vmem:[#allocation2] sm:$0xff]  ;;  %v216_v57 = vand.u32 2147483647, %v206_v27 }
  0xcc   :  { %v133_v1 = vrot.slane %v132_v63, 1  ;;  %v169_v23 = vld [vmem:[#allocation3] sm:$0xff] }
  0xcd   :  { %v88_v36 = vrot.slane %v87_v35, 4 }
  0xce   :  { %vm134_vm15 = vcmp.lt.s32.totalorder %v132_v63, %v133_v1 }
  0xcf   :  { %v89_v37 = vadd.f32 %v88_v36, %v87_v35  ;;  %v135_v9 = vsel %vm134_vm15, %v132_v63, %v133_v1  ;;  %v155_v28 = vld [vmem:[#allocation2 + $0x8] sm:$0x7f] }
  0xd0   :  { %vm136_vm2 = vcmp.eq.s32.totalorder %v135_v9, %v67_v8  ;;  %v170_v30 = vld [vmem:[#allocation3 + $0x8] sm:$0x7f] }
  0xd1   :  { %v90_v38 = vrot.slane %v89_v37, 2  ;;  %v296_v13 = vsel %vm136_vm2, 1.0, %v342_v4 }
  0xd2   :  { %v185_v16 = vperm.slane %v296_v13, 0 }
  0xd3   :  { %v91_v39 = vadd.f32 %v90_v38, %v89_v37  ;;  %v183_v37 = vld [vmem:[#allocation4] sm:$0xff] }
  0xd5   :  { %v92_v40 = vrot.slane %v91_v39, 1 }
  0xd7   :  { %v93_v41 = vadd.f32 %v92_v40, %v91_v39  ;;  %v184_v40 = vld [vmem:[#allocation4 + $0x8] sm:$0x7f] }
  0xd9   :  { %308 = vrcp.f32 %v93_v41  ;;  %v112_v48 = vand.u32 2147483648, %v93_v41  ;;  %v110_v50 = vand.u32 2147483647, %v93_v41  ;;  %vm106_vm7 = vweird.f32 %v93_v41 }
  0xda   :  { %310 = vrcp.f32 %v206_v27 }
  0xdb   :  { %v113_v54 = vor.u32 1.1754944e-38, %v112_v48  ;;  %vm111_vm10 = vcmp.eq.f32.partialorder %v110_v50, 8.507059e+37 }
  0xdf   :  { %v309_v42 = vpop.eup %308 }
  0xe0   :  { %v102_v44 = vmul.f32 %v309_v42, %v93_v41  ;;  %vm107_vm6 = vweird.f32 %v309_v42  ;;  %v311_v36 = vpop.eup %310 }
  0xe1   :  { %vm108_vm9 = vmor %vm106_vm7, %vm107_vm6  ;;  %v208_v38 = vmul.f32 %v311_v36, %v206_v27  ;;  %vm212_vm6 = vweird.f32 %v206_v27  ;;  %vm213_vm7 = vweird.f32 %v311_v36 }
  0xe2   :  { %v103_v45 = vsub.f32 1.0, %v102_v44 }
  0xe3   :  { %v209_v47 = vsub.f32 1.0, %v208_v38 }
  0xe4   :  { %v104_v49 = vmul.f32 %v309_v42, %v103_v45 }
  0xe5   :  { %v210_v50 = vmul.f32 %v311_v36, %v209_v47 }
  0xe6   :  { %v105_v51 = vadd.f32 %v309_v42, %v104_v49 }
  0xe8   :  { %v109_v55 = vsel %vm108_vm9, %v309_v42, %v105_v51 }
  0xe9   :  { %v114_v56 = vsel %vm111_vm10, %v113_v54, %v109_v55  ;;  %vm441_vm10 = vmor %vm212_vm6, %vm213_vm7 }
  0xea   :  { %v115_v58 = vsel %vm404_vm8, %v114_v56, 0.0  ;;  %v211_v56 = vadd.f32 %v311_v36, %v210_v50 }
  0xeb   :  { %v139_v59 = vmul.f32 15.0, %v115_v58 }
  0xed   :  { %v140_v60 = vceil.f32 %v139_v59 }
  0xef   :  { %v301_v61 = vcvt.f32.s32 %v140_v60 }
  0xf1   :  { %v297_v62 = vadd.s32 4294967295, %v301_v61 }
  0xf3   :  { %vm143_vm12 = vcmp.gt.s32.totalorder %v297_v62, 0 }
  0xf4   :  { %v144_v0 = vsel %vm143_vm12, %v297_v62, 0  ;;  %vm217_vm12 = vcmp.eq.f32.partialorder %v216_v57, 8.507059e+37 }
  0xf5   :  { %vm145_vm13 = vcmp.lt.s32.totalorder %v144_v0, 14 }
  0xf6   :  { %v146_v2 = vsel %vm145_vm13, %v144_v0, 14 }
  0xf7   :  { %v147_v3 = vsel %vm404_vm8, %v146_v2, 15 }
  0xf8   :  { %vm148_vm14 = vcmp.eq.s32.totalorder %v390_v17, %v147_v3  ;;  %vm149_vm1 = vcmp.eq.s32.totalorder %v393_v20, %v147_v3 }
  0xf9   :  { %v298_v5 = vsel %vm148_vm14, 1.0, %v342_v4  ;;  %v299_v11 = vsel %vm149_vm1, 1.0, %v342_v4 }
  0xfa   :  { %v156_v6 = vsel %vm68_vm0, %v298_v5, 0.0  ;;  %v171_v7 = vmul.f32 %v298_v5, %v115_v58  ;;  %v172_v12 = vmul.f32 %v299_v11, %v115_v58  ;;  %v160_v14 = vsel %vm159_vm3, %v299_v11, 0.0 }
  0xfb   :  { %157 = vadd.xlane.f32.xlu1 %v156_v6  ;;  %v186_v17 = vmul.f32 %v298_v5, %v185_v16  ;;  %v187_v18 = vmul.f32 %v299_v11, %v185_v16  ;;  %v218_v58 = vand.u32 2147483648, %v206_v27  ;;  %v215_v5 = vsel %vm441_vm10, %v311_v36, %v211_v56 }
  0xfc   :  { %v173_v10 = vsel %vm68_vm0, %v171_v7, 0.0  ;;  %v176_v15 = vsel %vm159_vm3, %v172_v12, 0.0 }
  0xfd   :  { %174 = vadd.xlane.f32.xlu2 %v173_v10  ;;  %v188_v19 = vsel %vm68_vm0, %v186_v17, 0.0  ;;  %v191_v20 = vsel %vm159_vm3, %v187_v18, 0.0  ;;  %v219_v6 = vor.u32 1.1754944e-38, %v218_v58 }
  0xff   :  { %v220_v12 = vsel %vm217_vm12, %v219_v6, %v215_v5 }
 0x103   :  { %161 = vadd.xlane.f32.xlu1 %v160_v14 }
 0x105   :  { %177 = vadd.xlane.f32.xlu2 %v176_v15 }
 0x10b   :  { %189 = vadd.xlane.f32.xlu1 %v188_v19 }
 0x10d   :  { %192 = vadd.xlane.f32.xlu2 %v191_v20 }
 0x16e   :  { %v158_v22 = vpop.xlane.xlu1 %157 }
 0x16f   :  { %v163_v24 = vadd.f32 %v158_v22, %v154_v21 }
 0x170   :  { %v175_v25 = vpop.xlane.xlu2 %174 }
 0x171   :  { %166 = vst.msk [vmem:[#allocation2] sm:$0xff] %vm19_vm4, %v163_v24  ;;  %v179_v26 = vadd.f32 %v175_v25, %v169_v23 }
 0x173   :  { %181 = vst.msk [vmem:[#allocation3] sm:$0xff] %vm19_vm4, %v179_v26 }
 0x176   :  { %v162_v29 = vpop.xlane.xlu1 %161 }
 0x177   :  { %v164_v31 = vadd.f32 %v162_v29, %v155_v28 }
 0x178   :  { %v178_v32 = vpop.xlane.xlu2 %177  ;;  %v431_v33 = vld [vmem:[#allocation2] sm:$0xff] }
 0x179   :  { %168 = vst.msk [vmem:[#allocation2 + $0x8] sm:$0x7f] %vm21_vm5, %v164_v31  ;;  %v180_v34 = vadd.f32 %v178_v32, %v170_v30  ;;  %v203_v35 = vmax.f32 %v431_v33, 1.0  ;;  %v221_v19 = vmul.f32 %v220_v12, %v431_v33  ;;  %vm265_vm2 = vcmp.gt.f32.partialorder %v431_v33, 0.0 }
 0x17a   :  { %v223_v63 = vld [vmem:[#allocation3] sm:$0xff] }
 0x17b   :  { %182 = vst.msk [vmem:[#allocation3 + $0x8] sm:$0x7f] %vm21_vm5, %v180_v34  ;;  %312 = vrcp.f32 %v203_v35  ;;  %v236_v51 = vand.u32 2147483648, %v203_v35  ;;  %v234_v53 = vand.u32 2147483647, %v203_v35  ;;  %vm230_vm8 = vweird.f32 %v203_v35 }
 0x17d   :  { %v237_v59 = vor.u32 1.1754944e-38, %v236_v51  ;;  %vm235_vm11 = vcmp.eq.f32.partialorder %v234_v53, 8.507059e+37 }
 0x17e   :  { %v190_v39 = vpop.xlane.xlu1 %189 }
 0x17f   :  { %v194_v41 = vadd.f32 %v190_v39, %v183_v37 }
 0x180   :  { %v193_v42 = vpop.xlane.xlu2 %192  ;;  %v436_v43 = vld [vmem:[#allocation2 + $0x8] sm:$0x7f] }
 0x181   :  { %v313_v44 = vpop.eup %312  ;;  %196 = vst.msk [vmem:[#allocation4] sm:$0xff] %vm19_vm4, %v194_v41  ;;  %v195_v45 = vadd.f32 %v193_v42, %v184_v40  ;;  %v204_v46 = vmax.f32 %v436_v43, 1.0  ;;  %v222_v24 = vmul.f32 %v220_v12, %v436_v43  ;;  %vm266_vm3 = vcmp.gt.f32.partialorder %v436_v43, 0.0 }
 0x182   :  { %v226_v48 = vmul.f32 %v313_v44, %v203_v35  ;;  %vm231_vm0 = vweird.f32 %v313_v44  ;;  %v224_v16 = vld [vmem:[#allocation3 + $0x8] sm:$0x7f] }
 0x183   :  { %197 = vst.msk [vmem:[#allocation4 + $0x8] sm:$0x7f] %vm21_vm5, %v195_v45  ;;  %314 = vrcp.f32 %v204_v46  ;;  %vm232_vm9 = vmor %vm230_vm8, %vm231_vm0  ;;  %v251_v7 = vand.u32 2147483648, %v204_v46  ;;  %v249_v9 = vand.u32 2147483647, %v204_v46  ;;  %vm245_vm14 = vweird.f32 %v204_v46 }
 0x184   :  { %v227_v49 = vsub.f32 1.0, %v226_v48  ;;  %vm278_vm0 = vcmask 0  }
 0x185   :  { %v252_v13 = vor.u32 1.1754944e-38, %v251_v7  ;;  %vm250_vm1 = vcmp.eq.f32.partialorder %v249_v9, 8.507059e+37 }
 0x186   :  { %v228_v52 = vmul.f32 %v313_v44, %v227_v49 }
 0x188   :  { %v229_v54 = vadd.f32 %v313_v44, %v228_v52  ;;  %v255_v1 = vld [vmem:[#allocation4] sm:$0xff] }
 0x189   :  { %v315_v55 = vpop.eup %314 }
 0x18a   :  { %v233_v61 = vsel %vm232_vm9, %v313_v44, %v229_v54  ;;  %v241_v62 = vmul.f32 %v315_v55, %v204_v46  ;;  %vm246_vm13 = vweird.f32 %v315_v55  ;;  %v256_v18 = vld [vmem:[#allocation4 + $0x8] sm:$0x7f] }
 0x18b   :  { %v238_v0 = vsel %vm235_vm11, %v237_v59, %v233_v61  ;;  %vm247_vm15 = vmor %vm245_vm14, %vm246_vm13 }
 0x18c   :  { %v239_v2 = vmul.f32 %v238_v0, %v223_v63  ;;  %v242_v3 = vsub.f32 1.0, %v241_v62  ;;  %v257_v4 = vmul.f32 %v255_v1, %v238_v0 }
 0x18e   :  { %v243_v8 = vmul.f32 %v315_v55, %v242_v3  ;;  %v259_v10 = vsub.f32 %v239_v2, %v257_v4 }
 0x190   :  { %v244_v11 = vadd.f32 %v315_v55, %v243_v8  ;;  %v261_v15 = vand.u32 2147483647, %v259_v10 }
 0x192   :  { %v248_v14 = vsel %vm247_vm15, %v315_v55, %v244_v11  ;;  %v263_v23 = vmul.f32 %v261_v15, %v221_v19 }
 0x193   :  { %v253_v17 = vsel %vm250_vm1, %v252_v13, %v248_v14 }
 0x194   :  { %v254_v20 = vmul.f32 %v253_v17, %v224_v16  ;;  %v258_v21 = vmul.f32 %v256_v18, %v253_v17  ;;  %v267_v27 = vsel %vm265_vm2, %v263_v23, 0.0 }
 0x195   :  { %v269_v29 = vsel %vm19_vm4, %v267_v27, 0.0 }
 0x196   :  { %v260_v22 = vsub.f32 %v254_v20, %v258_v21 }
 0x198   :  { %v262_v25 = vand.u32 2147483647, %v260_v22 }
 0x19a   :  { %v264_v26 = vmul.f32 %v262_v25, %v222_v24 }
 0x19c   :  { %v268_v28 = vsel %vm266_vm3, %v264_v26, 0.0 }
 0x19d   :  { %v270_v30 = vsel %vm21_vm5, %v268_v28, 0.0 }
 0x19e   :  { %v271_v31 = vadd.f32 %v270_v30, %v269_v29 }
 0x1a0   :  { %v272_v32 = vrot.slane %v271_v31, 4 }
 0x1a2   :  { %v273_v34 = vadd.f32 %v272_v32, %v271_v31 }
 0x1a4   :  { %v274_v35 = vrot.slane %v273_v34, 2 }
 0x1a6   :  { %v275_v36 = vadd.f32 %v274_v35, %v273_v34 }
 0x1a8   :  { %v276_v33 = vrot.slane %v275_v36, 1 }
 0x1aa   :  { %v277_v37 = vadd.f32 %v276_v33, %v275_v36 }
 0x1ac   :  { %279 = vst.msk [vmem:[#allocation7] sm:$0x1] %vm278_vm0, %v277_v37 }
 0x1ad   :  { %290 = dma.vmem_to_hbm [thread:$0]  %s286_s6, 16, %s288_s9, [#allocation8]  }
 0x1ae   :  { %340 = dma.done.wait [#allocation8], 16  }
 0x1af   :  { %341 = vsyncadd [#allocation8], 4294967280 }
 0x1b0   :  { %295 = vsyncpa [#allocation8], 1 }

</bundles_post_ra>
